<compile_context>
chip_gen: v7x
topology: tpu7x:2x2x1
jax: 0.10.0
libtpu: 0.0.40
codegen_flags: <defaults>
</compile_context>

<pallas_src>
import jax
import jax.numpy as jnp
from jax.experimental import pallas as pl
from jax.experimental.pallas import tpu as pltpu

_TILE_BYTES = 2 * 1024 * 1024  # ~2 MiB per tile -> ~8 MiB live VMEM (in+out, 2x buffered)


def _mish_kernel(x_ref, o_ref):
    """Elementwise Mish on one (block_rows, lane) tile, native-dtype I/O.

    Mish(y) = y * tanh(softplus(y)); torch's softplus uses threshold=20
    (returns y verbatim above it, where tanh has saturated to 1 in f32).

    Identity: tanh(softplus(y)) = e^y (e^y + 2) / (e^y (e^y + 2) + 2)
    -> one EUP exp + one approx EUP reciprocal (+ one Newton step on VALU).
    """
    y = x_ref[...].astype(jnp.float32)
    t = jnp.exp(jnp.minimum(y, 20.0))
    num = t * (t + 2.0)
    den = num + 2.0
    r = pl.reciprocal(den, approx=True)
    r = r * (2.0 - den * r)                 # Newton refinement: free VALU, ~f32-exact
    tanh_sp = num * r
    out = jnp.where(y > 20.0, y, y * tanh_sp)
    o_ref[...] = out.astype(o_ref.dtype)


def _choose_lane(n):
    """Largest lane-dense width (multiple of 128) that divides n exactly."""
    for lane in (1024, 512, 256, 128):
        if n % lane == 0:
            return lane
    return None


def _pick_block_rows(rows, lane, dtype, tile_bytes):
    """Dtype-aware block-rows choice: ~tile_bytes tiles, >=2 grid steps when useful."""
    itemsize = jnp.dtype(dtype).itemsize
    sub = max(8, 32 // itemsize)            # sublane multiple: f32 8, bf16 16, int8/fp8 32
    max_block_rows = max(sub, (tile_bytes // (lane * itemsize)) // sub * sub)
    if rows > max_block_rows:
        return max_block_rows               # grid >= 2 automatically
    if rows >= 2 * sub:
        # Split so the grid has at least 2 steps (keeps v7x's 2nd TC busy).
        half = pl.cdiv(rows, 2)
        return pl.cdiv(half, sub) * sub
    return rows                             # full second-to-last dim (always legal)


def mish(x, *, tile_bytes=_TILE_BYTES):
    """Apply Mish elementwise to an arbitrarily-shaped array via a tiled Pallas kernel."""
    if x.size == 0:
        return x
    orig_shape = x.shape
    dtype = x.dtype
    n = x.size

    flat = x.reshape(-1)                    # no dtype cast, no pad in the common path
    lane = _choose_lane(n)
    pad = 0
    if lane is None:
        # Rare fallback: element count not a multiple of 128 -> one pad pass.
        lane = 128
        pad = (-n) % lane
        flat = jnp.pad(flat, (0, pad))

    rows = (n + pad) // lane
    block_rows = _pick_block_rows(rows, lane, dtype, tile_bytes)
    grid = (pl.cdiv(rows, block_rows),)     # ragged last block handled by Pallas masking

    x2 = flat.reshape(rows, lane)
    out = pl.pallas_call(
        _mish_kernel,
        out_shape=jax.ShapeDtypeStruct((rows, lane), dtype),
        grid=grid,
        in_specs=[pl.BlockSpec((block_rows, lane), lambda i: (i, 0))],
        out_specs=pl.BlockSpec((block_rows, lane), lambda i: (i, 0)),
        compiler_params=pltpu.CompilerParams(
            dimension_semantics=("parallel",),   # megacore-shardable on v7x
        ),
        # TODO(synk): callers that donate `x` can pass input_output_aliases={0: 0}
        # to write in place and drop the output HBM allocation.
    )(x2)

    out_flat = out.reshape(-1)
    if pad:
        out_flat = out_flat[:n]
    return out_flat.reshape(orig_shape)


def _mish_ref(x):
    xf = x.astype(jnp.float32)
    return xf * jnp.tanh(jax.nn.softplus(xf))


if __name__ == "__main__":
    key = jax.random.PRNGKey(0)
    # Small NCHW-style input, matching the CSPDarknet53 context this module lives in.
    x = 4.0 * jax.random.normal(key, (2, 4, 16, 16), jnp.float32)

    y = mish(x)
    jax.block_until_ready(y)

    assert y.shape == x.shape and y.dtype == x.dtype, (y.shape, y.dtype)
    assert bool(jnp.isfinite(y).all())

    ref = _mish_ref(x)
    rel_err = float(jnp.max(jnp.abs(y.astype(jnp.float32) - ref) / (jnp.abs(ref) + 1e-3)))
    assert rel_err < 2e-3, rel_err

    print("KERNEL_OK")
</pallas_src>

<mosaic_0001>
module attributes {stable_mosaic.version = 11 : i64} {
  func.func @_mish_kernel(%arg0: i32, %arg1: memref<2x1024xf32, #tpu.memory_space<vmem>>, %arg2: memref<2x1024xf32, #tpu.memory_space<vmem>>) attributes {dimension_semantics = [#tpu.dimension_semantics<parallel>], iteration_bounds = array<i64: 1>, scalar_prefetch = 0 : i64, scratch_operands = 0 : i64, tpu.core_type = #tpu.core_type<tc>, window_params = [{transform_indices = @transform_0, window_bounds = array<i64: 2, 1024>}, {transform_indices = @transform_1, window_bounds = array<i64: 2, 1024>}]} {
    %c0 = arith.constant 0 : index
    %c0_0 = arith.constant 0 : index
    %0 = vector.load %arg1[%c0, %c0_0] : memref<2x1024xf32, #tpu.memory_space<vmem>>, vector<2x1024xf32>
    %cst = arith.constant 2.000000e+01 : f32
    %1 = vector.broadcast %cst : f32 to vector<2x1024xf32>
    %2 = arith.minimumf %0, %1 : vector<2x1024xf32>
    %3 = math.exp %2 : vector<2x1024xf32>
    %cst_1 = arith.constant 2.000000e+00 : f32
    %4 = vector.broadcast %cst_1 : f32 to vector<2x1024xf32>
    %5 = arith.addf %3, %4 : vector<2x1024xf32>
    %6 = arith.mulf %3, %5 : vector<2x1024xf32>
    %cst_2 = arith.constant 2.000000e+00 : f32
    %7 = vector.broadcast %cst_2 : f32 to vector<2x1024xf32>
    %8 = arith.addf %6, %7 : vector<2x1024xf32>
    %9 = tpu.reciprocal %8 {approx = true} : vector<2x1024xf32> -> vector<2x1024xf32>
    %10 = arith.mulf %8, %9 : vector<2x1024xf32>
    %cst_3 = arith.constant 2.000000e+00 : f32
    %11 = vector.broadcast %cst_3 : f32 to vector<2x1024xf32>
    %12 = arith.subf %11, %10 : vector<2x1024xf32>
    %13 = arith.mulf %9, %12 : vector<2x1024xf32>
    %14 = arith.mulf %6, %13 : vector<2x1024xf32>
    %cst_4 = arith.constant 2.000000e+01 : f32
    %15 = vector.broadcast %cst_4 : f32 to vector<2x1024xf32>
    %16 = arith.cmpf ogt, %0, %15 : vector<2x1024xf32>
    %17 = arith.mulf %0, %14 : vector<2x1024xf32>
    %18 = arith.select %16, %0, %17 : vector<2x1024xi1>, vector<2x1024xf32>
    %c0_5 = arith.constant 0 : index
    %c0_6 = arith.constant 0 : index
    %19 = vector.load %arg2[%c0_5, %c0_6] : memref<2x1024xf32, #tpu.memory_space<vmem>>, vector<2x1024xf32>
    tpu.vector_store %arg2[%c0_5, %c0_6], %18 {strides = array<i32>} : memref<2x1024xf32, #tpu.memory_space<vmem>>, vector<2x1024xf32>,
    return
  }
  func.func @transform_0(%arg0: i32) -> (i32, i32) {
    %c0_i32 = arith.constant 0 : i32
    %c0_i32_0 = arith.constant 0 : i32
    return %arg0, %c0_i32 : i32, i32
  }
  func.func @transform_1(%arg0: i32) -> (i32, i32) {
    %c0_i32 = arith.constant 0 : i32
    %c0_i32_0 = arith.constant 0 : i32
    return %arg0, %c0_i32 : i32, i32
  }
}

</mosaic_0001>

<bundles_post_ra>
// kernel: tpu_custom_call.1
= control target key start
LH: loop header
LB: loop body
LE: loop exit
PB: predicated region body
PF: predicated region fallthrough
CT: control target
= control target key end

     0   :  { %6 = vsyncpa [#allocation3], 0  ;;  %s162_s0 = inlined_call_operand.hbm [shape: f32[2,1024], index: 0, kind: input, shape index: {}]   ;;  %s163_s1 = inlined_call_operand.hbm [shape: f32[2,1024], index: 1, kind: output, shape index: {}]  }
   0x1   :  { %7 = vsyncpa [#allocation4], 0  ;;  %s126_s6 = smov [#allocation2]   ;;  %s78_s10 = scalar_lea.hbm %s162_s0, 256 }
   0x2   :  { %s14_s7 = sshll.u32 %s126_s6, 4  ;;  %p79_p0 = scmp.ne.s32.totalorder %s162_s0, %s78_s10  ;;  %s15_s7 = int_to_ptr.vmem [resolvable:$true] %s14_s7 }
   0x3   :  { %p82_p1 = scmp.lt.u32.totalorder %s78_s10, %s162_s0 }
   0x5   :  { %p84_p2 = pnand %p82_p1, %p79_p0 }
   0x7   :  { %87 = shalt.err (!%p84_p2)
}
   0x8   :  { %s88_s15 = scalar_lea.vmem %s15_s7, 256  ;;  %p93_p4 = scmp.lt.s32.totalorder %s15_s7, %s15_s7 }
   0x9   :  { %p89_p3 = scmp.ne.s32.totalorder %s15_s7, %s88_s15  ;;  %p94_p5 = scmp.lt.s32.totalorder %s88_s15, %s88_s15 }
   0xb   :  { %p95_p6 = por %p94_p5, %p93_p4 }
   0xd   :  { %p96_p7 = pnand %p95_p6, %p89_p3 }
   0xf   :  { %99 = shalt.err (!%p96_p7)
}
  0x10   :  { %17 = dma.hbm_to_vmem [thread:$0]  %s162_s0, 256, %s15_s7, [#allocation3]  }
  0x11   :  { %122 = dma.done.wait [#allocation3], 256  }
  0x12   :  { %123 = vsyncadd [#allocation3], 4294967040  ;;  %v21_v0 = vld [vmem:[#allocation2] sm:$0xff]  ;;  %v22_v1 = vld [vmem:[#allocation2 + $0x8] sm:$0xff]  ;;  %s127_s0 = smov [#allocation5]  }
  0x13   :  { %v23_v2 = vmin.f32 %v21_v0, 20.0  ;;  %v24_v3 = vmin.f32 %v22_v1, 20.0  ;;  %vm45_vm0 = vcmp.gt.f32.partialorder %v21_v0, 20.0  ;;  %s59_s18 = sshll.u32 %s127_s0, 4  ;;  %vm46_vm1 = vcmp.gt.f32.partialorder %v22_v1, 20.0  ;;  %s60_s18 = int_to_ptr.vmem [resolvable:$true] %s59_s18 }
  0x14   :  { %s100_s19 = scalar_lea.vmem %s60_s18, 256  ;;  %p105_p9 = scmp.lt.s32.totalorder %s60_s18, %s60_s18 }
  0x15   :  { %v25_v4 = vmul.f32 1.442695, %v23_v2  ;;  %v27_v5 = vmul.f32 1.442695, %v24_v3  ;;  %p101_p8 = scmp.ne.s32.totalorder %s60_s18, %s100_s19  ;;  %p106_p10 = scmp.lt.s32.totalorder %s100_s19, %s100_s19 }
  0x17   :  { %70 = vpow2.f32 %v25_v4  ;;  %p107_p11 = por %p106_p10, %p105_p9 }
  0x18   :  { %72 = vpow2.f32 %v27_v5 }
  0x19   :  { %p108_p12 = pnand %p107_p11, %p101_p8 }
  0x21   :  { %v71_v6 = vpop.eup %70 }
  0x22   :  { %v73_v7 = vpop.eup %72  ;;  %v29_v8 = vadd.f32 2.0, %v71_v6 }
  0x23   :  { %v30_v9 = vadd.f32 2.0, %v73_v7 }
  0x24   :  { %v31_v10 = vmul.f32 %v71_v6, %v29_v8 }
  0x25   :  { %v32_v11 = vmul.f32 %v73_v7, %v30_v9 }
  0x26   :  { %v33_v12 = vadd.f32 2.0, %v31_v10 }
  0x27   :  { %v34_v13 = vadd.f32 2.0, %v32_v11 }
  0x28   :  { %74 = vrcp.f32 %v33_v12 }
  0x29   :  { %76 = vrcp.f32 %v34_v13 }
  0x32   :  { %v75_v14 = vpop.eup %74 }
  0x33   :  { %v77_v15 = vpop.eup %76  ;;  %v37_v16 = vmul.f32 %v75_v14, %v33_v12 }
  0x34   :  { %v38_v17 = vmul.f32 %v77_v15, %v34_v13 }
  0x35   :  { %v39_v18 = vsub.f32 2.0, %v37_v16 }
  0x36   :  { %v40_v19 = vsub.f32 2.0, %v38_v17 }
  0x37   :  { %v41_v20 = vmul.f32 %v75_v14, %v39_v18 }
  0x38   :  { %v42_v21 = vmul.f32 %v77_v15, %v40_v19 }
  0x39   :  { %v43_v22 = vmul.f32 %v41_v20, %v31_v10 }
  0x3a   :  { %v44_v23 = vmul.f32 %v42_v21, %v32_v11 }
  0x3b   :  { %v47_v24 = vmul.f32 %v43_v22, %v21_v0 }
  0x3c   :  { %v48_v25 = vmul.f32 %v44_v23, %v22_v1 }
  0x3d   :  { %v49_v26 = vsel %vm45_vm0, %v21_v0, %v47_v24 }
  0x3e   :  { %51 = vst [vmem:[#allocation5] sm:$0xff] %v49_v26  ;;  %v50_v27 = vsel %vm46_vm1, %v22_v1, %v48_v25 }
  0x3f   :  { %52 = vst [vmem:[#allocation5 + $0x8] sm:$0xff] %v50_v27 }
  0x40   :  { %111 = shalt.err (!%p108_p12)
}
  0x41   :  { %s112_s22 = scalar_lea.hbm %s163_s1, 256 }
  0x42   :  { %p113_p13 = scmp.ne.s32.totalorder %s163_s1, %s112_s22  ;;  %p116_p0 = scmp.lt.u32.totalorder %s112_s22, %s163_s1 }
  0x44   :  { %p118_p1 = pnand %p116_p0, %p113_p13 }
  0x46   :  { %121 = shalt.err (!%p118_p1)
}
  0x47   :  { %62 = dma.vmem_to_hbm [thread:$0]  %s60_s18, 256, %s163_s1, [#allocation4]  }
  0x48   :  { %124 = dma.done.wait [#allocation4], 256  }
  0x49   :  { %125 = vsyncadd [#allocation4], 4294967040 }
  0x4a   :  { %66 = vsyncpa [#allocation3], 1 }
  0x4b   :  { %67 = vsyncpa [#allocation4], 1 }

</bundles_post_ra>
